<compile_context>
chip_gen: v7x
topology: tpu7x:2x2x1
jax: 0.10.0
libtpu: 0.0.40
codegen_flags: <defaults>
</compile_context>

<pallas_src>
import functools

import jax
import jax.numpy as jnp
from jax import lax
from jax.experimental import pallas as pl
from jax.experimental.pallas import tpu as pltpu

_SUBLANE = 8    # f32 sublane granularity for batch tiles
_LANE = 128     # lane width (hidden / output alignment)


def _round_up(x: int, m: int) -> int:
    return (x + m - 1) // m * m


# ----------------------------------------------------------------------------
# Kernel
# ----------------------------------------------------------------------------
def _random_fourier_kernel(x_ref, w1_ref, w2_ref, o_ref, acc_ref, *, d_out):
    """Grid = (batch tiles, hidden chunks); hidden axis is the reduction.

    x_ref:   [TB, D_in]        streamed batch tile
    w1_ref:  [D_in, TH]        hidden-weight chunk (pre-transposed, bf16)
    w2_ref:  [TH, D_out_pad]   output-weight chunk (pre-transposed, bf16)
    o_ref:   [TB, D_out_pad]   softmax probabilities (lane-dense, padded)
    acc_ref: [TB, D_out_pad]   f32 logits accumulator (scratch)
    """
    k = pl.program_id(1)

    @pl.when(k == 0)
    def _init():
        acc_ref[...] = jnp.zeros_like(acc_ref)

    # Feed the MXU in bf16, accumulate in f32; cos stays in f32.
    x = x_ref[...].astype(jnp.bfloat16)
    h = jnp.cos(jnp.dot(x, w1_ref[...], preferred_element_type=jnp.float32))
    acc_ref[...] += jnp.dot(h.astype(jnp.bfloat16), w2_ref[...],
                            preferred_element_type=jnp.float32)

    @pl.when(k == pl.num_programs(1) - 1)
    def _finalize():
        logits = acc_ref[...]
        if d_out < logits.shape[-1]:
            # Zero-padded W2 columns produce logit 0; mask them out of the
            # softmax (max / exp / sum) so the real classes normalize to 1.
            lane = lax.broadcasted_iota(jnp.int32, logits.shape, 1)
            logits = jnp.where(lane < d_out, logits, -jnp.inf)
        m = jnp.max(logits, axis=-1, keepdims=True)
        e = jnp.exp(logits - m)
        denom = jnp.sum(e, axis=-1, keepdims=True)
        o_ref[...] = (e * pl.reciprocal(denom, approx=True)).astype(o_ref.dtype)


# ----------------------------------------------------------------------------
# One-time parameter preparation (do NOT call per forward)
# ----------------------------------------------------------------------------
def random_fourier_prepare_params(w_hidden, w_out, *,
                                  param_dtype=jnp.bfloat16,
                                  hidden_align=_LANE,
                                  out_align=_LANE):
    """torch layouts: w_hidden [H, D_in], w_out [D_out, H].

    Returns (w1_t [D_in, H_pad], w2_t [H_pad, D_out_pad], d_out).

    H is zero-padded to `hidden_align` (128 covers every MXU; 256 is worth it
    on v6e/v7x when large-H compute-bound): padded W1 columns -> cos(0)=1
    hidden units hitting zero W2 rows, logits unchanged.  D_out is zero-padded
    to 128 for lane-dense stores; padded logit lanes are masked in-kernel.
    """
    w1 = jnp.asarray(w_hidden)            # [H, D_in]
    w2 = jnp.asarray(w_out)               # [D_out, H]
    H, d_in = w1.shape
    d_out, h2 = w2.shape
    assert H == h2
    H_pad = _round_up(H, hidden_align)
    d_out_pad = _round_up(d_out, out_align)

    w1_t = jnp.zeros((d_in, H_pad), param_dtype)
    w1_t = w1_t.at[:, :H].set(w1.T.astype(param_dtype))          # [D_in, H_pad]
    w2_t = jnp.zeros((H_pad, d_out_pad), param_dtype)
    w2_t = w2_t.at[:H, :d_out].set(w2.T.astype(param_dtype))     # [H_pad, D_out_pad]
    return w1_t, w2_t, d_out


# ----------------------------------------------------------------------------
# Tiling heuristics
# ----------------------------------------------------------------------------
def _default_vmem_budget():
    # ~3/4 of physical VMEM: ~96 MiB on v5e/v6e (128 MiB), ~48 MiB on v7x (64 MiB).
    try:
        cap = int(pltpu.get_tpu_info().vmem_capacity_bytes)
        return min(cap * 3 // 4, 100 * 1024 * 1024)
    except Exception:
        return 48 * 1024 * 1024


def _pick_tile_h(H_pad, max_tile_h):
    """Largest multiple of 128 that divides H_pad and fits max_tile_h."""
    if H_pad <= max_tile_h:
        return H_pad
    start = max(_LANE, max_tile_h - max_tile_h % _LANE)
    for cand in range(start, 0, -_LANE):
        if H_pad % cand == 0:
            return cand
    return _LANE  # unreachable: _LANE always divides H_pad


def _default_tile_b(B, D_in, tile_h, d_out_pad, x_itemsize, w_itemsize,
                    w_buffers, x_buffers, vmem_budget_bytes):
    """Largest multiple-of-8 batch tile fitting the budget, capped at 1024 and
    at ceil(B/2) so the grid has >= 2 batch steps when B allows it (DMA/compute
    overlap; balanced work when the batch axis is sharded over v7x's TCs)."""
    weights_resident = w_buffers * (D_in * tile_h + tile_h * d_out_pad) * w_itemsize
    budget = max(vmem_budget_bytes - weights_resident, 1 << 20)
    per_row = (x_buffers * D_in * x_itemsize   # pipelined x tiles
               + 2 * d_out_pad * 4             # pipelined output tiles (f32)
               + d_out_pad * 4                 # logits accumulator scratch
               + D_in * 2                      # bf16 x copy
               + tile_h * 4 + tile_h * 2       # f32 h chunk + bf16 h copy
               + 3 * d_out_pad * 4)            # masked logits / exp / prob temps
    cap = max(_SUBLANE, (budget // per_row) // _SUBLANE * _SUBLANE)
    tile_b = min(1024, cap)
    if B > _SUBLANE:
        tile_b = min(tile_b, _round_up(-(-B // 2), _SUBLANE))
    return max(_SUBLANE, min(tile_b, _round_up(B, _SUBLANE)))


# ----------------------------------------------------------------------------
# Forward
# ----------------------------------------------------------------------------
def random_fourier_forward(x, w1_t, w2_t, d_out, *,
                           tile_b=None,
                           max_tile_h=2048,
                           vmem_budget_bytes=None,
                           out_dtype=jnp.float32,
                           x_buffers=2,
                           core_parallel=False):
    """x: [B, D_in] (f32 or bf16); (w1_t, w2_t, d_out) from
    random_fourier_prepare_params.  Returns softmax probabilities [B, d_out]."""
    B, D_in = x.shape
    d_in_w, H_pad = w1_t.shape
    h_w, d_out_pad = w2_t.shape
    assert D_in == d_in_w and H_pad == h_w and d_out <= d_out_pad
    assert H_pad % _LANE == 0 and d_out_pad % _LANE == 0

    if vmem_budget_bytes is None:
        vmem_budget_bytes = _default_vmem_budget()

    tile_h = _pick_tile_h(H_pad, max(_LANE, _round_up(int(max_tile_h), _LANE)))
    nk = H_pad // tile_h
    w_buffers = 1 if nk == 1 else 2
    w_itemsize = jnp.dtype(w1_t.dtype).itemsize

    if tile_b is None:
        tile_b = _default_tile_b(B, D_in, tile_h, d_out_pad,
                                 jnp.dtype(x.dtype).itemsize, w_itemsize,
                                 w_buffers, x_buffers, vmem_budget_bytes)
    tile_b = max(_SUBLANE, _round_up(int(tile_b), _SUBLANE))

    # No jnp.pad of x (that would re-materialize the whole activation in HBM):
    # cdiv grid + Pallas' masked edge-block stores handle ragged B.  Safe only
    # because the softmax is row-local.
    nb = pl.cdiv(B, tile_b)
    grid = (nb, nk)

    # Constant-index weight blocks (single H chunk) are never re-fetched by the
    # pipeline, so single-buffer them; chunked weights keep double-buffering.
    w_pipe = {"pipeline_mode": pl.Buffered(1)} if nk == 1 else {}
    # Optional deeper x pipeline (e.g. 3 on v5e's slower HBM).
    x_pipe = {"pipeline_mode": pl.Buffered(int(x_buffers))} if x_buffers != 2 else {}

    batch_sem = pltpu.CORE_PARALLEL if core_parallel else "parallel"

    kernel = functools.partial(_random_fourier_kernel, d_out=int(d_out))

    out = pl.pallas_call(
        kernel,
        out_shape=jax.ShapeDtypeStruct((B, d_out_pad), out_dtype),
        grid_spec=pltpu.PrefetchScalarGridSpec(
            num_scalar_prefetch=0,
            grid=grid,
            in_specs=[
                pl.BlockSpec((tile_b, D_in), lambda i, k: (i, 0), **x_pipe),
                pl.BlockSpec((D_in, tile_h), lambda i, k: (0, k), **w_pipe),
                pl.BlockSpec((tile_h, d_out_pad), lambda i, k: (k, 0), **w_pipe),
            ],
            out_specs=pl.BlockSpec((tile_b, d_out_pad), lambda i, k: (i, 0)),
            scratch_shapes=[pltpu.VMEM((tile_b, d_out_pad), jnp.float32)],
        ),
        compiler_params=pltpu.CompilerParams(
            dimension_semantics=(batch_sem, "arbitrary"),
            vmem_limit_bytes=int(vmem_budget_bytes),
        ),
    )(x, w1_t, w2_t)

    return out if d_out_pad == d_out else out[:, :d_out]


# ----------------------------------------------------------------------------
# Demo / self-check
# ----------------------------------------------------------------------------
if __name__ == "__main__":
    # Small shapes consistent with the module's two Linear layers.
    B, D_IN, H, D_OUT = 8, 16, 32, 8

    key = jax.random.PRNGKey(0)
    k_x, k_w1, k_w2 = jax.random.split(key, 3)

    x = jax.random.normal(k_x, (B, D_IN), dtype=jnp.float32)

    # Parameters matching __init__ semantics:
    #   hidden.weight ~ Normal(0, 0.04), shape [H, D_IN], frozen
    #   out.weight    ~ U(-1/sqrt(H), 1/sqrt(H)), shape [D_OUT, H]
    w_hidden = 0.04 * jax.random.normal(k_w1, (H, D_IN), dtype=jnp.float32)
    bound = 1.0 / jnp.sqrt(jnp.float32(H))
    w_out = jax.random.uniform(k_w2, (D_OUT, H), dtype=jnp.float32,
                               minval=-bound, maxval=bound)

    # One-time weight prep (transpose + pad + bf16 cast), outside the forward.
    w1_t, w2_t, d_out = random_fourier_prepare_params(w_hidden, w_out)

    y = random_fourier_forward(x, w1_t, w2_t, d_out)
    y = jax.block_until_ready(y)
    assert y.shape == (B, D_OUT)

    # Reference matching the kernel's arithmetic (bf16 MXU inputs, f32 accum).
    x_bf = x.astype(jnp.bfloat16)
    h_ref = jnp.cos(jnp.dot(x_bf, w1_t, preferred_element_type=jnp.float32))
    logits_ref = jnp.dot(h_ref.astype(jnp.bfloat16), w2_t,
                         preferred_element_type=jnp.float32)[:, :d_out]
    ref = jax.nn.softmax(logits_ref, axis=-1)
    assert jnp.allclose(y, ref, atol=5e-3, rtol=5e-3), "mismatch vs bf16 reference"

    # Pure-f32 end-to-end semantics check (loose tol: bf16 MXU inputs).
    ref32 = jax.nn.softmax(jnp.cos(x @ w_hidden.T) @ w_out.T, axis=-1)
    assert jnp.allclose(y, ref32, atol=5e-2, rtol=5e-2), "mismatch vs f32 reference"
    assert jnp.allclose(jnp.sum(y, axis=-1), 1.0, atol=5e-3), "rows must sum to 1"

    print("KERNEL_OK")
</pallas_src>

<mosaic_0001>
module attributes {stable_mosaic.version = 11 : i64} {
  func.func @_random_fourier_kernel(%arg0: i32, %arg1: i32, %arg2: memref<8x16xf32, #tpu.memory_space<vmem>>, %arg3: memref<16x128xbf16, #tpu.memory_space<vmem>>, %arg4: memref<128x128xbf16, #tpu.memory_space<vmem>>, %arg5: memref<8x128xf32, #tpu.memory_space<vmem>>, %arg6: memref<8x128xf32, #tpu.memory_space<vmem>>) attributes {dimension_semantics = [#tpu.dimension_semantics<parallel>, #tpu.dimension_semantics<arbitrary>], iteration_bounds = array<i64: 1, 1>, scalar_prefetch = 0 : i64, scratch_operands = 1 : i64, tpu.core_type = #tpu.core_type<tc>, window_params = [{transform_indices = @transform_0, window_bounds = array<i64: 8, 16>}, {pipeline_mode = #tpu.pipeline_mode<synchronous>, transform_indices = @transform_1, window_bounds = array<i64: 16, 128>}, {pipeline_mode = #tpu.pipeline_mode<synchronous>, transform_indices = @transform_2, window_bounds = array<i64: 128, 128>}, {transform_indices = @transform_3, window_bounds = array<i64: 8, 128>}]} {
    %c0_i32 = arith.constant 0 : i32
    %0 = arith.cmpi eq, %arg1, %c0_i32 : i32
    %1 = arith.extui %0 : i1 to i32
    %c0_i32_0 = arith.constant 0 : i32
    %2 = arith.cmpi ne, %1, %c0_i32_0 : i32
    scf.if %2 {
      %cst_13 = arith.constant 0.000000e+00 : f32
      %17 = vector.broadcast %cst_13 : f32 to vector<8x128xf32>
      %c0_14 = arith.constant 0 : index
      %c0_15 = arith.constant 0 : index
      %18 = vector.load %arg6[%c0_14, %c0_15] : memref<8x128xf32, #tpu.memory_space<vmem>>, vector<8x128xf32>
      tpu.vector_store %arg6[%c0_14, %c0_15], %17 {strides = array<i32>} : memref<8x128xf32, #tpu.memory_space<vmem>>, vector<8x128xf32>,
    } else {
    }
    %c0 = arith.constant 0 : index
    %c0_1 = arith.constant 0 : index
    %3 = vector.load %arg2[%c0, %c0_1] : memref<8x16xf32, #tpu.memory_space<vmem>>, vector<8x16xf32>
    %4 = arith.truncf %3 : vector<8x16xf32> to vector<8x16xbf16>
    %c0_2 = arith.constant 0 : index
    %c0_3 = arith.constant 0 : index
    %5 = vector.load %arg3[%c0_2, %c0_3] : memref<16x128xbf16, #tpu.memory_space<vmem>>, vector<16x128xbf16>
    %cst = arith.constant dense<0.000000e+00> : vector<8x128xf32>
    %6 = tpu.matmul %4, %5, %cst {dimension_numbers = #tpu.dot_dimension_numbers<[1], [0], [0], [1], [0, 0, 1, 1], [], []>} : vector<8x16xbf16>, vector<16x128xbf16>, vector<8x128xf32> -> vector<8x128xf32>
    %7 = math.cos %6 : vector<8x128xf32>
    %c0_4 = arith.constant 0 : index
    %c0_5 = arith.constant 0 : index
    %8 = vector.load %arg6[%c0_4, %c0_5] : memref<8x128xf32, #tpu.memory_space<vmem>>, vector<8x128xf32>
    %9 = arith.truncf %7 : vector<8x128xf32> to vector<8x128xbf16>
    %c0_6 = arith.constant 0 : index
    %c0_7 = arith.constant 0 : index
    %10 = vector.load %arg4[%c0_6, %c0_7] : memref<128x128xbf16, #tpu.memory_space<vmem>>, vector<128x128xbf16>
    %cst_8 = arith.constant dense<0.000000e+00> : vector<8x128xf32>
    %11 = tpu.matmul %9, %10, %cst_8 {dimension_numbers = #tpu.dot_dimension_numbers<[1], [0], [0], [1], [0, 0, 1, 1], [], []>} : vector<8x128xbf16>, vector<128x128xbf16>, vector<8x128xf32> -> vector<8x128xf32>
    %12 = arith.addf %8, %11 : vector<8x128xf32>
    %c0_9 = arith.constant 0 : index
    %c0_10 = arith.constant 0 : index
    %13 = vector.load %arg6[%c0_9, %c0_10] : memref<8x128xf32, #tpu.memory_space<vmem>>, vector<8x128xf32>
    tpu.vector_store %arg6[%c0_9, %c0_10], %12 {strides = array<i32>} : memref<8x128xf32, #tpu.memory_space<vmem>>, vector<8x128xf32>,
    %c0_i32_11 = arith.constant 0 : i32
    %14 = arith.cmpi eq, %arg1, %c0_i32_11 : i32
    %15 = arith.extui %14 : i1 to i32
    %c0_i32_12 = arith.constant 0 : i32
    %16 = arith.cmpi ne, %15, %c0_i32_12 : i32
    scf.if %16 {
      %c0_13 = arith.constant 0 : index
      %c0_14 = arith.constant 0 : index
      %17 = vector.load %arg6[%c0_13, %c0_14] : memref<8x128xf32, #tpu.memory_space<vmem>>, vector<8x128xf32>
      %18 = tpu.iota {dimensions = array<i32: 1>} : vector<8x128xi32>
      %c8_i32 = arith.constant 8 : i32
      %19 = vector.broadcast %c8_i32 : i32 to vector<8x128xi32>
      %20 = arith.cmpi slt, %18, %19 : vector<8x128xi32>
      %cst_15 = arith.constant 0xFF800000 : f32
      %21 = vector.broadcast %cst_15 : f32 to vector<8x128xf32>
      %22 = arith.select %20, %17, %21 : vector<8x128xi1>, vector<8x128xf32>
      %cst_16 = arith.constant dense<0xFF800000> : vector<8xf32>
      %23 = vector.multi_reduction <maximumf>, %22, %cst_16 [1] : vector<8x128xf32> to vector<8xf32>
      %24 = vector.shape_cast %23 : vector<8xf32> to vector<8x1xf32>
      %25 = vector.broadcast %24 : vector<8x1xf32> to vector<8x128xf32>
      %26 = arith.subf %22, %25 : vector<8x128xf32>
      %27 = math.exp %26 : vector<8x128xf32>
      %cst_17 = arith.constant dense<0.000000e+00> : vector<8xf32>
      %28 = vector.multi_reduction <add>, %27, %cst_17 [1] : vector<8x128xf32> to vector<8xf32>
      %29 = vector.shape_cast %28 : vector<8xf32> to vector<8x1xf32>
      %30 = tpu.reciprocal %29 {approx = true} : vector<8x1xf32> -> vector<8x1xf32>
      %31 = vector.broadcast %30 : vector<8x1xf32> to vector<8x128xf32>
      %32 = arith.mulf %27, %31 : vector<8x128xf32>
      %c0_18 = arith.constant 0 : index
      %c0_19 = arith.constant 0 : index
      %33 = vector.load %arg5[%c0_18, %c0_19] : memref<8x128xf32, #tpu.memory_space<vmem>>, vector<8x128xf32>
      tpu.vector_store %arg5[%c0_18, %c0_19], %32 {strides = array<i32>} : memref<8x128xf32, #tpu.memory_space<vmem>>, vector<8x128xf32>,
    } else {
    }
    return
  }
  func.func @transform_0(%arg0: i32, %arg1: i32) -> (i32, i32) {
    %c0_i32 = arith.constant 0 : i32
    %c0_i32_0 = arith.constant 0 : i32
    return %arg0, %c0_i32 : i32, i32
  }
  func.func @transform_1(%arg0: i32, %arg1: i32) -> (i32, i32) {
    %c0_i32 = arith.constant 0 : i32
    %c0_i32_0 = arith.constant 0 : i32
    return %c0_i32, %arg1 : i32, i32
  }
  func.func @transform_2(%arg0: i32, %arg1: i32) -> (i32, i32) {
    %c0_i32 = arith.constant 0 : i32
    %c0_i32_0 = arith.constant 0 : i32
    return %arg1, %c0_i32 : i32, i32
  }
  func.func @transform_3(%arg0: i32, %arg1: i32) -> (i32, i32) {
    %c0_i32 = arith.constant 0 : i32
    %c0_i32_0 = arith.constant 0 : i32
    return %arg0, %c0_i32 : i32, i32
  }
}

</mosaic_0001>

<bundles_post_ra>
// kernel: tpu_custom_call.1
= control target key start
LH: loop header
LB: loop body
LE: loop exit
PB: predicated region body
PF: predicated region fallthrough
CT: control target
= control target key end

     0   :  { %8 = vsyncpa [#allocation4], 0  ;;  %s648_s0 = inlined_call_operand.hbm [shape: f32[8,16], index: 0, kind: input, shape index: {}]   ;;  %s649_s1 = inlined_call_operand.hbm [shape: bf16[16,128], index: 1, kind: input, shape index: {}]   ;;  %s650_s2 = inlined_call_operand.hbm [shape: bf16[128,128], index: 2, kind: input, shape index: {}]   ;;  %s651_s3 = inlined_call_operand.hbm [shape: f32[8,128], index: 3, kind: output, shape index: {}]  }
   0x1   :  { %9 = vsyncpa [#allocation7], 0 }
   0x2   :  { %10 = vsyncpa [#allocation5], 0  ;;  %s539_s12 = smov [#allocation6]   ;;  %s445_s16 = scalar_lea.hbm %s649_s1, 128 }
   0x3   :  { %s26_s13 = sshll.u32 %s539_s12, 4  ;;  %p446_p0 = scmp.ne.s32.totalorder %s649_s1, %s445_s16  ;;  %s27_s13 = int_to_ptr.vmem [resolvable:$true] %s26_s13 }
   0x4   :  { %p449_p1 = scmp.lt.u32.totalorder %s445_s16, %s649_s1 }
   0x6   :  { %p451_p2 = pnand %p449_p1, %p446_p0 }
   0x8   :  { %454 = shalt.err (!%p451_p2)
}
   0x9   :  { %s455_s21 = scalar_lea.vmem %s27_s13, 128  ;;  %p460_p4 = scmp.lt.s32.totalorder %s27_s13, %s27_s13 }
   0xa   :  { %p456_p3 = scmp.ne.s32.totalorder %s27_s13, %s455_s21  ;;  %p461_p5 = scmp.lt.s32.totalorder %s455_s21, %s455_s21 }
   0xc   :  { %p462_p6 = por %p461_p5, %p460_p4 }
   0xe   :  { %p463_p7 = pnand %p462_p6, %p456_p3 }
  0x10   :  { %466 = shalt.err (!%p463_p7)
}
  0x11   :  { %s540_s22 = smov 64   ;;  %s541_s23 = smov 4  }
  0x12   :  { %32 = dma.hbm_to_vmem [thread:$0]  %s649_s1, 128, %s27_s13, [#allocation7], %s540_s22, %s540_s22, %s541_s23  }
  0x13   :  { %s542_s26 = smov [#allocation3]   ;;  %s543_s28 = smov [#allocation8]  }
  0x14   :  { %s17_s27 = sshll.u32 %s542_s26, 4  ;;  %s38_s29 = sshll.u32 %s543_s28, 4  ;;  %s18_s27 = int_to_ptr.vmem [resolvable:$true] %s17_s27  ;;  %s39_s29 = int_to_ptr.vmem [resolvable:$true] %s38_s29 }
  0x15   :  { %s467_s5 = scalar_lea.hbm %s648_s0, 128 }
  0x16   :  { %p468_p8 = scmp.ne.s32.totalorder %s648_s0, %s467_s5  ;;  %p471_p9 = scmp.lt.u32.totalorder %s467_s5, %s648_s0 }
  0x18   :  { %p473_p10 = pnand %p471_p9, %p468_p8 }
  0x1a   :  { %476 = shalt.err (!%p473_p10)
}
  0x1b   :  { %s477_s1 = scalar_lea.vmem %s18_s27, 128  ;;  %p482_p12 = scmp.lt.s32.totalorder %s18_s27, %s18_s27 }
  0x1c   :  { %p478_p11 = scmp.ne.s32.totalorder %s18_s27, %s477_s1  ;;  %p483_p13 = scmp.lt.s32.totalorder %s477_s1, %s477_s1 }
  0x1e   :  { %p484_p0 = por %p483_p13, %p482_p12 }
  0x20   :  { %p485_p1 = pnand %p484_p0, %p478_p11 }
  0x22   :  { %488 = shalt.err (!%p485_p1)
}
  0x23   :  { %20 = dma.hbm_to_vmem [thread:$0]  %s648_s0, 128, %s18_s27, [#allocation4]  }
  0x24   :  { %s489_s14 = scalar_lea.hbm %s650_s2, 1024 }
  0x25   :  { %p490_p2 = scmp.ne.s32.totalorder %s650_s2, %s489_s14  ;;  %p493_p3 = scmp.lt.u32.totalorder %s489_s14, %s650_s2 }
  0x27   :  { %p495_p4 = pnand %p493_p3, %p490_p2 }
  0x29   :  { %498 = shalt.err (!%p495_p4)
}
  0x2a   :  { %s499_s19 = scalar_lea.vmem %s39_s29, 1024  ;;  %p504_p6 = scmp.lt.s32.totalorder %s39_s29, %s39_s29 }
  0x2b   :  { %p500_p5 = scmp.ne.s32.totalorder %s39_s29, %s499_s19  ;;  %p505_p7 = scmp.lt.s32.totalorder %s499_s19, %s499_s19 }
  0x2d   :  { %p506_p8 = por %p505_p7, %p504_p6 }
  0x2f   :  { %p507_p9 = pnand %p506_p8, %p500_p5 }
  0x31   :  { %510 = shalt.err (!%p507_p9)
}
  0x32   :  { %44 = dma.hbm_to_vmem [thread:$0]  %s650_s2, 1024, %s39_s29, [#allocation7], %s540_s22, %s540_s22, %s541_s23  }
  0x33   :  { %533 = dma.done.wait [#allocation4], 128  }
  0x34   :  { %534 = vsyncadd [#allocation4], 4294967168 }
  0x35   :  { %535 = dma.done.wait [#allocation7], 1152  }
  0x36   :  { %536 = vsyncadd [#allocation7], 4294966144  ;;  %v544_v0 = vmov 0.0   ;;  %vm545_vm0 = vmmov 0   ;;  %v428_v1 = vld [vmem:[#allocation6] sm:$0xff]   ;;  %v60_v2 = vld [vmem:[#allocation3] sm:$0xff] }
  0x37   :  { %384 = vmatprep.subr.bf16.mxu0 %v544_v0  ;;  %386 = vmatprep.mubr.msk.bf16.mxu0 %vm545_vm0, %v544_v0  ;;  %vm70_vm1 = vcmask 130048   ;;  %v61_v3 = vpack.c.bf16 %v60_v2, %v60_v2  ;;  %v429_v4 = vld [vmem:[#allocation8] sm:$0xff]   ;;  %v430_v5 = vld [vmem:[#allocation8 + $0x8] sm:$0xff]   ;;  %v431_v6 = vld [vmem:[#allocation8 + $0x10] sm:$0xff]   ;;  %v546_v26 = vmov 683565275  }
  0x38   :  { %390 = vmatprep.subr.bf16.mxu1 %v544_v0  ;;  %406 = vmatprep.mubr.msk.bf16.mxu1 %vm545_vm0, %v544_v0  ;;  %v432_v7 = vld [vmem:[#allocation8 + $0x18] sm:$0xff]   ;;  %v433_v8 = vld [vmem:[#allocation8 + $0x20] sm:$0xff]   ;;  %v434_v9 = vld [vmem:[#allocation8 + $0x28] sm:$0xff]   ;;  %v547_v28 = vmov 2475754826   ;;  %s552_s2 = smov [#allocation9]  }
  0x39   :  { %385 = vmatpush3.bf16.msra.mxu0 %v428_v1  ;;  %391 = vmatpush3.bf16.msra.mxu1 %v429_v4  ;;  %v435_v10 = vld [vmem:[#allocation8 + $0x30] sm:$0xff]   ;;  %v436_v11 = vld [vmem:[#allocation8 + $0x38] sm:$0xff]   ;;  %v548_v31 = vmov 2131351028   ;;  %v549_v34 = vmov 2102212464  }
  0x3a   :  { %392 = vmatprep.subr.bf16.mxu1 %v544_v0  ;;  %v550_v37 = vmov 920167782   ;;  %v551_v40 = vmov 1326507024   ;;  %s349_s21 = sshll.u32 %s552_s2, 4  ;;  %s350_s21 = int_to_ptr.vmem [resolvable:$true] %s349_s21 }
  0x3b   :  { %s511_s22 = scalar_lea.vmem %s350_s21, 128  ;;  %p516_p11 = scmp.lt.s32.totalorder %s350_s21, %s350_s21 }
  0x3c   :  { %387 = vmatmul.mubr.msk.bf16.vlgmr.msra.gmra.mrb[0].mxu0 %vm70_vm1, %v61_v3  ;;  %p512_p10 = scmp.ne.s32.totalorder %s350_s21, %s511_s22  ;;  %p517_p12 = scmp.lt.s32.totalorder %s511_s22, %s511_s22 }
  0x3d   :  { %393 = vmatpush3.bf16.msra.mxu1 %v430_v5 }
  0x3e   :  { %394 = vmatprep.subr.bf16.mxu1 %v544_v0  ;;  %p518_p13 = por %p517_p12, %p516_p11 }
  0x40   :  { %p519_p0 = pnand %p518_p13, %p512_p10 }
  0x41   :  { %395 = vmatpush3.bf16.msra.mxu1 %v431_v6 }
  0x42   :  { %396 = vmatprep.subr.bf16.mxu1 %v544_v0 }
  0x45   :  { %397 = vmatpush3.bf16.msra.mxu1 %v432_v7 }
  0x46   :  { %398 = vmatprep.subr.bf16.mxu1 %v544_v0 }
  0x49   :  { %399 = vmatpush3.bf16.msra.mxu1 %v433_v8 }
  0x4a   :  { %400 = vmatprep.subr.bf16.mxu1 %v544_v0 }
  0x4d   :  { %401 = vmatpush3.bf16.msra.mxu1 %v434_v9 }
  0x4e   :  { %402 = vmatprep.subr.bf16.mxu1 %v544_v0 }
  0x51   :  { %403 = vmatpush3.bf16.msra.mxu1 %v435_v10 }
  0x52   :  { %404 = vmatprep.subr.bf16.mxu1 %v544_v0 }
  0x55   :  { %405 = vmatpush3.bf16.msra.mxu1 %v436_v11 }
 0x10f   :  { %v615_v12 = vpop.f32.mrb[0].mxu0 }
 0x110   :  { %v117_v13 = vand.u32 2139095040, %v615_v12  ;;  %v388_v14 = vpop.f32.mrb[1].mxu0  ;;  %v114_v20 = vand.u32 2147483647, %v615_v12  ;;  %vm116_vm9 = vcmp.lt.s32.totalorder %v615_v12, 0  ;;  %vm206_vm14 = vweird.f32 %v615_v12 }
 0x111   :  { %v111_v15 = vpop.f32.mrb[2].mxu0 }
 0x112   :  { %v118_v16 = vshrl.u32 %v117_v13, 23  ;;  %v389_v17 = vpop.f32.mrb[3].mxu0  ;;  %v121_v23 = vand.u32 8388607, %v114_v20  ;;  %vm115_vm10 = vcmp.le.f32.partialorder %v114_v20, 0.7853982 }
 0x114   :  { %v361_v18 = vadd.s32 4294967169, %v118_v16  ;;  %v122_v42 = vor.u32 8388608, %v121_v23 }
 0x116   :  { %v124_v19 = vadd.s32 1, %v361_v18  ;;  %v162_v56 = vshll.u32 %v122_v42, 8 }
 0x118   :  { %vm125_vm2 = vcmp.gt.s32.totalorder %v124_v19, 0 }
 0x119   :  { %v126_v21 = vsel %vm125_vm2, %v124_v19, 0 }
 0x11a   :  { %v128_v22 = vand.u32 31, %v126_v21  ;;  %v127_v25 = vshrl.u32 %v126_v21, 5 }
 0x11c   :  { %v129_v24 = vsub.s32 32, %v128_v22  ;;  %v131_v27 = vshll.u32 %v546_v26, %v128_v22  ;;  %v134_v29 = vshll.u32 %v547_v28, %v128_v22  ;;  %v137_v33 = vshll.u32 %v548_v31, %v128_v22 }
 0x11d   :  { %v140_v36 = vshll.u32 %v549_v34, %v128_v22  ;;  %v143_v39 = vshll.u32 %v550_v37, %v128_v22  ;;  %vm146_vm3 = vcmp.lt.s32.totalorder %v127_v25, 1  ;;  %vm149_vm4 = vcmp.lt.s32.totalorder %v127_v25, 4 }
 0x11e   :  { %v132_v30 = vshrl.u32 %v547_v28, %v129_v24  ;;  %v135_v32 = vshrl.u32 %v548_v31, %v129_v24  ;;  %v138_v35 = vshrl.u32 %v549_v34, %v129_v24  ;;  %v141_v38 = vshrl.u32 %v550_v37, %v129_v24 }
 0x11f   :  { %v144_v41 = vshrl.u32 %v551_v40, %v129_v24  ;;  %v130_v51 = vshrl.u32 %v546_v26, %v129_v24  ;;  %vm148_vm5 = vcmp.lt.s32.totalorder %v127_v25, 3  ;;  %vm147_vm6 = vcmp.lt.s32.totalorder %v127_v25, 2 }
 0x120   :  { %v133_v43 = vor.u32 %v132_v30, %v131_v27  ;;  %v136_v44 = vor.u32 %v135_v32, %v134_v29  ;;  %v139_v45 = vor.u32 %v138_v35, %v137_v33  ;;  %v142_v46 = vor.u32 %v141_v38, %v140_v36 }
 0x121   :  { %v145_v47 = vor.u32 %v144_v41, %v143_v39 }
 0x122   :  { %v151_v48 = vsel %vm149_vm4, %v139_v45, 2102212464  ;;  %v154_v49 = vsel %vm146_vm3, %v133_v43, %v136_v44  ;;  %v158_v50 = vsel %vm146_vm3, %v136_v44, %v139_v45  ;;  %v155_v52 = vsel %vm149_vm4, %v142_v46, 920167782 }
 0x123   :  { %v159_v53 = vsel %vm149_vm4, %v145_v47, 1326507024  ;;  %v156_v54 = vsel %vm148_vm5, %v139_v45, %v155_v52  ;;  %v150_v57 = vsel %vm146_vm3, %v130_v51, %v133_v43  ;;  %v152_v58 = vsel %vm148_vm5, %v136_v44, %v151_v48 }
 0x124   :  { %v160_v55 = vsel %vm148_vm5, %v142_v46, %v159_v53  ;;  %v157_v59 = vsel %vm147_vm6, %v154_v49, %v156_v54  ;;  %v153_v1 = vsel %vm147_vm6, %v150_v57, %v152_v58  ;;  %v329_v44 = vlaneseq }
 0x125   :  { %v161_v60 = vsel %vm147_vm6, %v158_v50, %v160_v55  ;;  %v624_v63 = vmul.u32.u64.low %v162_v56, %v157_v59  ;;  %v625_v0 = vmul.u32.u64.high %v162_v56, %v157_v59, %v624_v63  ;;  %v169_v3 = vmul.u32 %v162_v56, %v153_v1 }
 0x126   :  { %v621_v61 = vmul.u32.u64.low %v162_v56, %v161_v60  ;;  %v622_v62 = vmul.u32.u64.high %v162_v56, %v161_v60, %v621_v61  ;;  %v330_v45 = vand.u32 127, %v329_v44 }
 0x127   :  { %v172_v2 = vadd.s32 1, %v625_v0 }
 0x128   :  { %vm171_vm7 = vc.u32 %v622_v62, %v624_v63  ;;  %v170_v16 = vadd.s32 %v624_v63, %v622_v62  ;;  %vm331_vm15 = vcmp.lt.s32.totalorder %v330_v45, 8 }
 0x129   :  { %v173_v4 = vsel %vm171_vm7, %v172_v2, %v625_v0 }
 0x12a   :  { %v174_v5 = vadd.s32 %v173_v4, %v169_v3 }
 0x12c   :  { %v175_v6 = vadd.s32 536870912, %v174_v5 }
 0x12e   :  { %v176_v7 = vshrl.u32 %v175_v6, 30 }
 0x130   :  { %v177_v8 = vshll.u32 %v176_v7, 30  ;;  %v200_v31 = vsub.s32 4, %v176_v7 }
 0x132   :  { %v178_v9 = vsub.s32 %v174_v5, %v177_v8  ;;  %v201_v33 = vsel %vm116_vm9, %v200_v31, %v176_v7 }
 0x133   :  { %v203_v34 = vsel %vm115_vm10, 0, %v201_v33 }
 0x134   :  { %v180_v10 = vsub.s32 0, %v178_v9  ;;  %v207_v35 = vand.u32 3, %v203_v34 }
 0x136   :  { %v362_v11 = vmin.u32 %v180_v10, %v178_v9  ;;  %vm212_vm11 = vcmp.eq.s32.totalorder %v207_v35, 2  ;;  %vm209_vm12 = vcmp.eq.s32.totalorder %v207_v35, 0  ;;  %vm208_vm13 = vcmp.lt.s32.totalorder %v207_v35, 2 }
 0x138   :  { %v182_v13 = vclz %v362_v11 }
 0x13a   :  { %v363_v14 = vadd.s32 4294967294, %v182_v13 }
 0x13c   :  { %vm364_vm8 = vcmp.lt.s32.totalorder %v363_v14, 0 }
 0x13d   :  { %v185_v15 = vsel %vm364_vm8, 0, %v363_v14 }
 0x13e   :  { %v186_v17 = vsub.s32 32, %v185_v15  ;;  %v190_v18 = vsub.s32 4294967266, %v185_v15  ;;  %v187_v19 = vshll.u32 %v178_v9, %v185_v15 }
 0x140   :  { %v188_v21 = vshrl.u32 %v170_v16, %v186_v17  ;;  %v191_v22 = vadd.s32 127, %v190_v18 }
 0x142   :  { %v189_v23 = vor.u32 %v188_v21, %v187_v19  ;;  %v192_v24 = vshll.u32 %v191_v22, 23 }
 0x144   :  { %v193_v25 = vor.u32 4788187, %v192_v24  ;;  %v196_v27 = vcvt.s32.f32 %v189_v23 }
 0x146   :  { %v194_v26 = vand.u32 2147483647, %v193_v25 }
 0x148   :  { %v197_v28 = vmul.f32 %v196_v27, %v194_v26 }
 0x14a   :  { %v198_v29 = vxor.u32 2147483648, %v197_v28 }
 0x14c   :  { %v199_v30 = vsel %vm116_vm9, %v198_v29, %v197_v28 }
 0x14d   :  { %v202_v32 = vsel %vm115_vm10, %v615_v12, %v199_v30 }
 0x14e   :  { %437 = vcosq.f32 %v202_v32 }
 0x14f   :  { %439 = vsinq.f32 %v202_v32 }
 0x158   :  { %v438_v36 = vpop.eup %437 }
 0x159   :  { %v440_v37 = vpop.eup %439  ;;  %v213_v38 = vxor.u32 2147483648, %v438_v36 }
 0x15a   :  { %v210_v39 = vxor.u32 2147483648, %v440_v37 }
 0x15b   :  { %v214_v40 = vsel %vm212_vm11, %v213_v38, %v440_v37 }
 0x15c   :  { %v211_v41 = vsel %vm209_vm12, %v438_v36, %v210_v39 }
 0x15d   :  { %v215_v20 = vsel %vm208_vm13, %v211_v41, %v214_v40 }
 0x15e   :  { %v216_v42 = vsel %vm206_vm14, nan, %v215_v20 }
 0x15f   :  { %v218_v43 = vpack.c.bf16 %v216_v42, %v216_v42 }
 0x161   :  { %407 = vmatmul.mubr.bf16.vlgmr.msra.gmra.mrb[0].mxu1 %v218_v43 }
 0x234   :  { %v317_v46 = vpop.f32.mrb[0].mxu1 }
 0x235   :  { %v408_v47 = vpop.f32.mrb[1].mxu1  ;;  %v332_v48 = vsel %vm331_vm15, %v317_v46, -inf }
 0x236   :  { %333 = vmax.xlane.f32.xlu0 %v332_v48  ;;  %v320_v49 = vpop.f32.mrb[2].mxu1 }
 0x237   :  { %v409_v50 = vpop.f32.mrb[3].mxu1 }
 0x2c3   :  { %v334_v51 = vpop.xlane.xlu0 %333 }
 0x2c4   :  { %v335_v52 = vsub.f32 %v332_v48, %v334_v51 }
 0x2c6   :  { %v336_v53 = vmul.f32 1.442695, %v335_v52 }
 0x2c8   :  { %441 = vpow2.f32 %v336_v53 }
 0x2d2   :  { %v442_v54 = vpop.eup %441 }
 0x2d3   :  { %338 = vadd.xlane.f32.xlu0 %v442_v54 }
 0x360   :  { %v339_v12 = vpop.xlane.xlu0 %338 }
 0x361   :  { %443 = vrcp.f32 %v339_v12 }
 0x36b   :  { %v444_v55 = vpop.eup %443 }
 0x36c   :  { %v341_v56 = vmul.f32 %v444_v55, %v442_v54 }
 0x36e   :  { %342 = vst [vmem:[#allocation9] sm:$0xff] %v341_v56 }
 0x36f   :  { %522 = shalt.err (!%p519_p0)
}
 0x370   :  { %s523_s25 = scalar_lea.hbm %s651_s3, 128 }
 0x371   :  { %p524_p1 = scmp.ne.s32.totalorder %s651_s3, %s523_s25  ;;  %p527_p2 = scmp.lt.u32.totalorder %s523_s25, %s651_s3 }
 0x373   :  { %p529_p3 = pnand %p527_p2, %p524_p1 }
 0x375   :  { %532 = shalt.err (!%p529_p3)
}
 0x376   :  { %352 = dma.vmem_to_hbm [thread:$0]  %s350_s21, 128, %s651_s3, [#allocation5]  }
 0x377   :  { %537 = dma.done.wait [#allocation5], 128  }
 0x378   :  { %538 = vsyncadd [#allocation5], 4294967168 }
 0x379   :  { %356 = vsyncpa [#allocation4], 1 }
 0x37a   :  { %357 = vsyncpa [#allocation7], 1 }
 0x37b   :  { %358 = vsyncpa [#allocation5], 1 }

</bundles_post_ra>
